<compile_context>
chip_gen: v7x
topology: tpu7x:2x2x1
jax: 0.10.0
libtpu: 0.0.40
codegen_flags: <defaults>
</compile_context>

<pallas_src>
import functools
import math

import jax
import jax.numpy as jnp
from jax.experimental import pallas as pl
from jax.experimental.pallas import tpu as pltpu


def _layernorm(v, w, b, eps=1e-5):
    mu = jnp.mean(v, axis=-1, keepdims=True)
    c = v - mu
    var = jnp.mean(c * c, axis=-1, keepdims=True)
    return c * jax.lax.rsqrt(var + eps) * w + b


def _mm(a, w):
    """f32-accumulating matmul with bf16 MXU operands: (M,K) @ (K,N) -> f32."""
    return jnp.dot(a.astype(jnp.bfloat16), w.astype(jnp.bfloat16),
                   preferred_element_type=jnp.float32)


def _mm_nt(a, b):
    """(M,K) x (N,K) -> (M,N), contracting K without an explicit transpose."""
    return jax.lax.dot_general(
        a.astype(jnp.bfloat16), b.astype(jnp.bfloat16),
        dimension_numbers=(((1,), (1,)), ((), ())),
        preferred_element_type=jnp.float32)


def clip_layer_kernel(n_head, tq,
                      x_ref,
                      ln1_w_ref, ln1_b_ref,
                      wq_ref, bq_ref, wkv_ref, bkv_ref,
                      w_out_ref, b_out_ref,
                      ln2_w_ref, ln2_b_ref,
                      w1_ref, b1_ref,
                      w2_ref, b2_ref,
                      o_ref):
    # Grid = (batch, query-tile).  x_ref is (1, S, D), o_ref is (1, tq, D).
    S, D = x_ref.shape[1], x_ref.shape[2]
    dh = D // n_head
    q_start = pl.multiple_of(pl.program_id(1) * tq, tq)

    ln1_w = ln1_w_ref[...]
    ln1_b = ln1_b_ref[...]

    # ---------------- LayerNorm 1 (f32) ----------------
    x_all = x_ref[0]                              # (S, D) full sequence (keys/values)
    x_q = x_ref[0, pl.ds(q_start, tq), :]         # (tq, D) this query tile
    xn_all = _layernorm(x_all, ln1_w, ln1_b)
    xn_q = _layernorm(x_q, ln1_w, ln1_b)

    # ---------------- causal self-attention ----------------
    # 1/sqrt(dh) is pre-folded into wq / bq in the wrapper.
    q_all = _mm(xn_q, wq_ref[...]) + bq_ref[...]        # (tq, D)  f32
    kv = _mm(xn_all, wkv_ref[...]) + bkv_ref[...]       # (S, 2D)  f32

    row = jax.lax.broadcasted_iota(jnp.int32, (tq, S), 0) + q_start
    col = jax.lax.broadcasted_iota(jnp.int32, (tq, S), 1)
    causal = col > row
    neg = jnp.float32(-1e30)

    heads = []
    for h in range(n_head):                              # static, per-head 2-D dots
        qh = q_all[:, h * dh:(h + 1) * dh]               # (tq, dh)
        kh = kv[:, h * dh:(h + 1) * dh]                  # (S, dh)
        vh = kv[:, D + h * dh:D + (h + 1) * dh]          # (S, dh)
        s = _mm_nt(qh, kh)                               # (tq, S) f32 scores
        s = jnp.where(causal, neg, s)
        s = s - jnp.max(s, axis=-1, keepdims=True)
        p = jnp.exp(s)
        p = p * pl.reciprocal(jnp.sum(p, axis=-1, keepdims=True), approx=True)
        heads.append(_mm(p, vh))                         # (tq, dh)
    attn = jnp.concatenate(heads, axis=-1)               # (tq, D)

    attn = _mm(attn, w_out_ref[...]) + b_out_ref[...]
    x1 = x_q + attn                                       # residual 1 (f32)

    # ---------------- LayerNorm 2 + MLP (QuickGELU) ----------------
    xn2 = _layernorm(x1, ln2_w_ref[...], ln2_b_ref[...])
    hdn = _mm(xn2, w1_ref[...]) + b1_ref[...]
    hdn = hdn * jax.nn.sigmoid(1.702 * hdn)               # QuickGELU, f32
    hdn = _mm(hdn, w2_ref[...]) + b2_ref[...]

    o_ref[0] = (x1 + hdn).astype(o_ref.dtype)             # residual 2


def _prep_params(params, n_head):
    """Split/scale/cast the f32 params into kernel-ready (bf16 weight) operands."""
    D = params['ln1_w'].shape[-1]
    dh = D // n_head
    scale = jnp.float32(1.0 / math.sqrt(dh))
    w_in, b_in = params['w_in'], params['b_in']
    wq = (w_in[:, :D] * scale).astype(jnp.bfloat16)       # scale folded into q proj
    bq = b_in[:, :D] * scale
    wkv = w_in[:, D:].astype(jnp.bfloat16)
    bkv = b_in[:, D:]
    return [
        params['ln1_w'], params['ln1_b'],
        wq, bq, wkv, bkv,
        params['w_out'].astype(jnp.bfloat16), params['b_out'],
        params['ln2_w'], params['ln2_b'],
        params['w1'].astype(jnp.bfloat16), params['b1'],
        params['w2'].astype(jnp.bfloat16), params['b2'],
    ]


def clip_layer(x, params, n_head, tq=None):
    """x: (B, S, D) float32. params: dict from init_params (f32, (in,out) layout)."""
    B, S, D = x.shape
    assert D % n_head == 0

    # Query tile: 256/128 rows when S allows, else one full-sequence tile.
    if tq is None:
        tq = S
        for t in (256, 128):
            if S % t == 0:
                tq = t
                break
    assert S % tq == 0
    nq = S // tq

    plist = _prep_params(params, n_head)

    def full_spec(shape):
        nd = len(shape)
        return pl.BlockSpec(shape, lambda b, q, _nd=nd: (0,) * _nd)

    in_specs = [pl.BlockSpec((1, S, D), lambda b, q: (b, 0, 0))]
    in_specs += [full_spec(p.shape) for p in plist]

    kernel = functools.partial(clip_layer_kernel, n_head, tq)

    # Explicit scoped-VMEM budget: weights (double-buffered by default) +
    # activation blocks + in-kernel working set, with headroom; capped at 64 MiB
    # so it stays within v7x physical VMEM.
    w_bytes = sum(int(p.size) * p.dtype.itemsize for p in plist)
    act_bytes = 4 * (S * D + tq * D) * 2
    work_bytes = 4 * (S * 3 * D + tq * 4 * D + 2 * tq * S + 2 * tq * D)
    vmem_limit = int(2 * w_bytes + act_bytes + 2 * work_bytes) + (8 << 20)
    vmem_limit = max(vmem_limit, 32 << 20)
    vmem_limit = min(vmem_limit, 64 << 20)

    return pl.pallas_call(
        kernel,
        out_shape=jax.ShapeDtypeStruct((B, S, D), x.dtype),
        grid_spec=pltpu.PrefetchScalarGridSpec(
            num_scalar_prefetch=0,
            grid=(B, nq),
            in_specs=in_specs,
            out_specs=pl.BlockSpec((1, tq, D), lambda b, q: (b, q, 0)),
        ),
        compiler_params=pltpu.CompilerParams(
            dimension_semantics=("parallel", "parallel"),
            vmem_limit_bytes=vmem_limit),
    )(x, *plist)


def init_params(key, n_embd):
    """Deterministic synthetic parameters (f32). Linear weights stored (in, out)."""
    D = n_embd
    ks = jax.random.split(key, 8)
    scale = 0.02
    return {
        'ln1_w': jnp.ones((1, D), jnp.float32),
        'ln1_b': jnp.zeros((1, D), jnp.float32),
        'w_in': scale * jax.random.normal(ks[0], (D, 3 * D), jnp.float32),
        'b_in': 0.01 * jax.random.normal(ks[1], (1, 3 * D), jnp.float32),
        'w_out': scale * jax.random.normal(ks[2], (D, D), jnp.float32),
        'b_out': 0.01 * jax.random.normal(ks[3], (1, D), jnp.float32),
        'ln2_w': jnp.ones((1, D), jnp.float32),
        'ln2_b': jnp.zeros((1, D), jnp.float32),
        'w1': scale * jax.random.normal(ks[4], (D, 4 * D), jnp.float32),
        'b1': 0.01 * jax.random.normal(ks[5], (1, 4 * D), jnp.float32),
        'w2': scale * jax.random.normal(ks[6], (4 * D, D), jnp.float32),
        'b2': 0.01 * jax.random.normal(ks[7], (1, D), jnp.float32),
    }


def clip_layer_reference(x, p, n_head):
    """Pure-JAX f32 reference matching the PyTorch forward semantics."""
    B, S, D = x.shape
    dh = D // n_head

    def ln(v, w, b):
        mu = v.mean(-1, keepdims=True)
        var = ((v - mu) ** 2).mean(-1, keepdims=True)
        return (v - mu) / jnp.sqrt(var + 1e-5) * w + b

    residue = x
    h = ln(x, p['ln1_w'], p['ln1_b'])
    qkv = h @ p['w_in'] + p['b_in']
    q, k, v = jnp.split(qkv, 3, axis=-1)
    q = q.reshape(B, S, n_head, dh).transpose(0, 2, 1, 3)
    k = k.reshape(B, S, n_head, dh).transpose(0, 2, 1, 3)
    v = v.reshape(B, S, n_head, dh).transpose(0, 2, 1, 3)
    w = jnp.einsum('bhqd,bhkd->bhqk', q, k)
    mask = jnp.triu(jnp.ones((S, S), bool), 1)
    w = jnp.where(mask[None, None], -jnp.inf, w) / jnp.sqrt(jnp.float32(dh))
    w = jax.nn.softmax(w, axis=-1)
    o = jnp.einsum('bhqk,bhkd->bhqd', w, v).transpose(0, 2, 1, 3).reshape(B, S, D)
    o = o @ p['w_out'] + p['b_out']
    x1 = o + residue

    residue = x1
    h = ln(x1, p['ln2_w'], p['ln2_b'])
    h = h @ p['w1'] + p['b1']
    h = h * jax.nn.sigmoid(1.702 * h)
    h = h @ p['w2'] + p['b2']
    return h + residue


if __name__ == "__main__":
    B, S, D, H = 2, 8, 32, 4
    key = jax.random.PRNGKey(0)
    kx, kp = jax.random.split(key)

    x = jax.random.normal(kx, (B, S, D), jnp.float32)
    params = init_params(kp, D)

    out = jax.block_until_ready(clip_layer(x, params, H))
    ref = clip_layer_reference(x, params, H)

    assert out.shape == (B, S, D)
    # bf16 MXU operands + approx softmax reciprocal => relaxed tolerance vs f32 ref.
    assert jnp.allclose(out, ref, atol=1e-2, rtol=1e-2), "mismatch vs reference"

    print("KERNEL_OK")
</pallas_src>

<mosaic_0001>
module attributes {stable_mosaic.version = 11 : i64} {
  func.func @clip_layer_kernel(%arg0: i32, %arg1: i32, %arg2: memref<1x8x32xf32, #tpu.memory_space<vmem>>, %arg3: memref<1x32xf32, #tpu.memory_space<vmem>>, %arg4: memref<1x32xf32, #tpu.memory_space<vmem>>, %arg5: memref<32x32xbf16, #tpu.memory_space<vmem>>, %arg6: memref<1x32xf32, #tpu.memory_space<vmem>>, %arg7: memref<32x64xbf16, #tpu.memory_space<vmem>>, %arg8: memref<1x64xf32, #tpu.memory_space<vmem>>, %arg9: memref<32x32xbf16, #tpu.memory_space<vmem>>, %arg10: memref<1x32xf32, #tpu.memory_space<vmem>>, %arg11: memref<1x32xf32, #tpu.memory_space<vmem>>, %arg12: memref<1x32xf32, #tpu.memory_space<vmem>>, %arg13: memref<32x128xbf16, #tpu.memory_space<vmem>>, %arg14: memref<1x128xf32, #tpu.memory_space<vmem>>, %arg15: memref<128x32xbf16, #tpu.memory_space<vmem>>, %arg16: memref<1x32xf32, #tpu.memory_space<vmem>>, %arg17: memref<1x8x32xf32, #tpu.memory_space<vmem>>) attributes {dimension_semantics = [#tpu.dimension_semantics<parallel>, #tpu.dimension_semantics<parallel>], iteration_bounds = array<i64: 2, 1>, scalar_prefetch = 0 : i64, scratch_operands = 0 : i64, tpu.core_type = #tpu.core_type<tc>, window_params = [{transform_indices = @transform_0, window_bounds = array<i64: 1, 8, 32>}, {pipeline_mode = #tpu.pipeline_mode<synchronous>, transform_indices = @transform_1, window_bounds = array<i64: 1, 32>}, {pipeline_mode = #tpu.pipeline_mode<synchronous>, transform_indices = @transform_2, window_bounds = array<i64: 1, 32>}, {pipeline_mode = #tpu.pipeline_mode<synchronous>, transform_indices = @transform_3, window_bounds = array<i64: 32, 32>}, {pipeline_mode = #tpu.pipeline_mode<synchronous>, transform_indices = @transform_4, window_bounds = array<i64: 1, 32>}, {pipeline_mode = #tpu.pipeline_mode<synchronous>, transform_indices = @transform_5, window_bounds = array<i64: 32, 64>}, {pipeline_mode = #tpu.pipeline_mode<synchronous>, transform_indices = @transform_6, window_bounds = array<i64: 1, 64>}, {pipeline_mode = #tpu.pipeline_mode<synchronous>, transform_indices = @transform_7, window_bounds = array<i64: 32, 32>}, {pipeline_mode = #tpu.pipeline_mode<synchronous>, transform_indices = @transform_8, window_bounds = array<i64: 1, 32>}, {pipeline_mode = #tpu.pipeline_mode<synchronous>, transform_indices = @transform_9, window_bounds = array<i64: 1, 32>}, {pipeline_mode = #tpu.pipeline_mode<synchronous>, transform_indices = @transform_10, window_bounds = array<i64: 1, 32>}, {pipeline_mode = #tpu.pipeline_mode<synchronous>, transform_indices = @transform_11, window_bounds = array<i64: 32, 128>}, {pipeline_mode = #tpu.pipeline_mode<synchronous>, transform_indices = @transform_12, window_bounds = array<i64: 1, 128>}, {pipeline_mode = #tpu.pipeline_mode<synchronous>, transform_indices = @transform_13, window_bounds = array<i64: 128, 32>}, {pipeline_mode = #tpu.pipeline_mode<synchronous>, transform_indices = @transform_14, window_bounds = array<i64: 1, 32>}, {transform_indices = @transform_15, window_bounds = array<i64: 1, 8, 32>}]} {
    %c8_i32 = arith.constant 8 : i32
    %0 = arith.muli %arg1, %c8_i32 : i32
    %1 = tpu.assume_multiple %0, 8 : i32
    %c0 = arith.constant 0 : index
    %c0_0 = arith.constant 0 : index
    %2 = vector.load %arg3[%c0, %c0_0] : memref<1x32xf32, #tpu.memory_space<vmem>>, vector<1x32xf32>
    %c0_1 = arith.constant 0 : index
    %c0_2 = arith.constant 0 : index
    %3 = vector.load %arg4[%c0_1, %c0_2] : memref<1x32xf32, #tpu.memory_space<vmem>>, vector<1x32xf32>
    %c0_3 = arith.constant 0 : index
    %c0_4 = arith.constant 0 : index
    %c0_5 = arith.constant 0 : index
    %4 = vector.load %arg2[%c0_3, %c0_4, %c0_5] : memref<1x8x32xf32, #tpu.memory_space<vmem>>, vector<1x8x32xf32>
    %5 = vector.shape_cast %4 : vector<1x8x32xf32> to vector<8x32xf32>
    %c0_6 = arith.constant 0 : index
    %6 = arith.index_cast %1 : i32 to index
    %c0_7 = arith.constant 0 : index
    %7 = vector.load %arg2[%c0_6, %6, %c0_7] : memref<1x8x32xf32, #tpu.memory_space<vmem>>, vector<1x8x32xf32>
    %8 = vector.shape_cast %7 : vector<1x8x32xf32> to vector<8x32xf32>
    %cst = arith.constant dense<0.000000e+00> : vector<8xf32>
    %9 = vector.multi_reduction <add>, %5, %cst [1] : vector<8x32xf32> to vector<8xf32>
    %10 = vector.shape_cast %9 : vector<8xf32> to vector<8x1xf32>
    %cst_8 = arith.constant 3.200000e+01 : f32
    %11 = vector.broadcast %cst_8 : f32 to vector<8x1xf32>
    %12 = arith.divf %10, %11 : vector<8x1xf32>
    %13 = vector.broadcast %12 : vector<8x1xf32> to vector<8x32xf32>
    %14 = arith.subf %5, %13 : vector<8x32xf32>
    %15 = arith.mulf %14, %14 : vector<8x32xf32>
    %cst_9 = arith.constant dense<0.000000e+00> : vector<8xf32>
    %16 = vector.multi_reduction <add>, %15, %cst_9 [1] : vector<8x32xf32> to vector<8xf32>
    %17 = vector.shape_cast %16 : vector<8xf32> to vector<8x1xf32>
    %cst_10 = arith.constant 3.200000e+01 : f32
    %18 = vector.broadcast %cst_10 : f32 to vector<8x1xf32>
    %19 = arith.divf %17, %18 : vector<8x1xf32>
    %cst_11 = arith.constant 9.99999974E-6 : f32
    %20 = vector.broadcast %cst_11 : f32 to vector<8x1xf32>
    %21 = arith.addf %19, %20 : vector<8x1xf32>
    %22 = math.rsqrt %21 : vector<8x1xf32>
    %23 = vector.broadcast %22 : vector<8x1xf32> to vector<8x32xf32>
    %24 = arith.mulf %14, %23 : vector<8x32xf32>
    %25 = vector.broadcast %2 : vector<1x32xf32> to vector<8x32xf32>
    %26 = arith.mulf %24, %25 : vector<8x32xf32>
    %27 = vector.broadcast %3 : vector<1x32xf32> to vector<8x32xf32>
    %28 = arith.addf %26, %27 : vector<8x32xf32>
    %cst_12 = arith.constant dense<0.000000e+00> : vector<8xf32>
    %29 = vector.multi_reduction <add>, %8, %cst_12 [1] : vector<8x32xf32> to vector<8xf32>
    %30 = vector.shape_cast %29 : vector<8xf32> to vector<8x1xf32>
    %cst_13 = arith.constant 3.200000e+01 : f32
    %31 = vector.broadcast %cst_13 : f32 to vector<8x1xf32>
    %32 = arith.divf %30, %31 : vector<8x1xf32>
    %33 = vector.broadcast %32 : vector<8x1xf32> to vector<8x32xf32>
    %34 = arith.subf %8, %33 : vector<8x32xf32>
    %35 = arith.mulf %34, %34 : vector<8x32xf32>
    %cst_14 = arith.constant dense<0.000000e+00> : vector<8xf32>
    %36 = vector.multi_reduction <add>, %35, %cst_14 [1] : vector<8x32xf32> to vector<8xf32>
    %37 = vector.shape_cast %36 : vector<8xf32> to vector<8x1xf32>
    %cst_15 = arith.constant 3.200000e+01 : f32
    %38 = vector.broadcast %cst_15 : f32 to vector<8x1xf32>
    %39 = arith.divf %37, %38 : vector<8x1xf32>
    %cst_16 = arith.constant 9.99999974E-6 : f32
    %40 = vector.broadcast %cst_16 : f32 to vector<8x1xf32>
    %41 = arith.addf %39, %40 : vector<8x1xf32>
    %42 = math.rsqrt %41 : vector<8x1xf32>
    %43 = vector.broadcast %42 : vector<8x1xf32> to vector<8x32xf32>
    %44 = arith.mulf %34, %43 : vector<8x32xf32>
    %45 = vector.broadcast %2 : vector<1x32xf32> to vector<8x32xf32>
    %46 = arith.mulf %44, %45 : vector<8x32xf32>
    %47 = vector.broadcast %3 : vector<1x32xf32> to vector<8x32xf32>
    %48 = arith.addf %46, %47 : vector<8x32xf32>
    %c0_17 = arith.constant 0 : index
    %c0_18 = arith.constant 0 : index
    %49 = vector.load %arg5[%c0_17, %c0_18] : memref<32x32xbf16, #tpu.memory_space<vmem>>, vector<32x32xbf16>
    %50 = arith.truncf %48 : vector<8x32xf32> to vector<8x32xbf16>
    %cst_19 = arith.constant dense<0.000000e+00> : vector<8x32xf32>
    %51 = tpu.matmul %50, %49, %cst_19 {dimension_numbers = #tpu.dot_dimension_numbers<[1], [0], [0], [1], [0, 0, 1, 1], [], []>} : vector<8x32xbf16>, vector<32x32xbf16>, vector<8x32xf32> -> vector<8x32xf32>
    %c0_20 = arith.constant 0 : index
    %c0_21 = arith.constant 0 : index
    %52 = vector.load %arg6[%c0_20, %c0_21] : memref<1x32xf32, #tpu.memory_space<vmem>>, vector<1x32xf32>
    %53 = vector.broadcast %52 : vector<1x32xf32> to vector<8x32xf32>
    %54 = arith.addf %51, %53 : vector<8x32xf32>
    %c0_22 = arith.constant 0 : index
    %c0_23 = arith.constant 0 : index
    %55 = vector.load %arg7[%c0_22, %c0_23] : memref<32x64xbf16, #tpu.memory_space<vmem>>, vector<32x64xbf16>
    %56 = arith.truncf %28 : vector<8x32xf32> to vector<8x32xbf16>
    %cst_24 = arith.constant dense<0.000000e+00> : vector<8x64xf32>
    %57 = tpu.matmul %56, %55, %cst_24 {dimension_numbers = #tpu.dot_dimension_numbers<[1], [0], [0], [1], [0, 0, 1, 1], [], []>} : vector<8x32xbf16>, vector<32x64xbf16>, vector<8x64xf32> -> vector<8x64xf32>
    %c0_25 = arith.constant 0 : index
    %c0_26 = arith.constant 0 : index
    %58 = vector.load %arg8[%c0_25, %c0_26] : memref<1x64xf32, #tpu.memory_space<vmem>>, vector<1x64xf32>
    %59 = vector.broadcast %58 : vector<1x64xf32> to vector<8x64xf32>
    %60 = arith.addf %57, %59 : vector<8x64xf32>
    %61 = tpu.iota {dimensions = array<i32: 0>} : vector<8x8xi32>
    %62 = vector.broadcast %1 : i32 to vector<8x8xi32>
    %63 = arith.addi %61, %62 : vector<8x8xi32>
    %64 = tpu.iota {dimensions = array<i32: 1>} : vector<8x8xi32>
    %65 = arith.cmpi sgt, %64, %63 : vector<8x8xi32>
    %66 = vector.extract_strided_slice %54 {offsets = [0, 0], sizes = [8, 8], strides = [1, 1]} : vector<8x32xf32> to vector<8x8xf32>
    %67 = vector.extract_strided_slice %60 {offsets = [0, 0], sizes = [8, 8], strides = [1, 1]} : vector<8x64xf32> to vector<8x8xf32>
    %68 = vector.extract_strided_slice %60 {offsets = [0, 32], sizes = [8, 8], strides = [1, 1]} : vector<8x64xf32> to vector<8x8xf32>
    %69 = arith.truncf %66 : vector<8x8xf32> to vector<8x8xbf16>
    %70 = arith.truncf %67 : vector<8x8xf32> to vector<8x8xbf16>
    %cst_27 = arith.constant dense<0.000000e+00> : vector<8x8xf32>
    %71 = tpu.matmul %69, %70, %cst_27 {dimension_numbers = #tpu.dot_dimension_numbers<[1], [1], [0], [0], [0, 0, 1, 0], [], []>} : vector<8x8xbf16>, vector<8x8xbf16>, vector<8x8xf32> -> vector<8x8xf32>
    %cst_28 = arith.constant -1.000000e+30 : f32
    %72 = vector.broadcast %cst_28 : f32 to vector<8x8xf32>
    %73 = arith.select %65, %72, %71 : vector<8x8xi1>, vector<8x8xf32>
    %cst_29 = arith.constant dense<0xFF800000> : vector<8xf32>
    %74 = vector.multi_reduction <maximumf>, %73, %cst_29 [1] : vector<8x8xf32> to vector<8xf32>
    %75 = vector.shape_cast %74 : vector<8xf32> to vector<8x1xf32>
    %76 = vector.broadcast %75 : vector<8x1xf32> to vector<8x8xf32>
    %77 = arith.subf %73, %76 : vector<8x8xf32>
    %78 = math.exp %77 : vector<8x8xf32>
    %cst_30 = arith.constant dense<0.000000e+00> : vector<8xf32>
    %79 = vector.multi_reduction <add>, %78, %cst_30 [1] : vector<8x8xf32> to vector<8xf32>
    %80 = vector.shape_cast %79 : vector<8xf32> to vector<8x1xf32>
    %81 = tpu.reciprocal %80 {approx = true} : vector<8x1xf32> -> vector<8x1xf32>
    %82 = vector.broadcast %81 : vector<8x1xf32> to vector<8x8xf32>
    %83 = arith.mulf %78, %82 : vector<8x8xf32>
    %84 = arith.truncf %83 : vector<8x8xf32> to vector<8x8xbf16>
    %85 = arith.truncf %68 : vector<8x8xf32> to vector<8x8xbf16>
    %cst_31 = arith.constant dense<0.000000e+00> : vector<8x8xf32>
    %86 = tpu.matmul %84, %85, %cst_31 {dimension_numbers = #tpu.dot_dimension_numbers<[1], [0], [0], [1], [0, 0, 1, 1], [], []>} : vector<8x8xbf16>, vector<8x8xbf16>, vector<8x8xf32> -> vector<8x8xf32>
    %87 = vector.extract_strided_slice %54 {offsets = [0, 8], sizes = [8, 8], strides = [1, 1]} : vector<8x32xf32> to vector<8x8xf32>
    %88 = vector.extract_strided_slice %60 {offsets = [0, 8], sizes = [8, 8], strides = [1, 1]} : vector<8x64xf32> to vector<8x8xf32>
    %89 = vector.extract_strided_slice %60 {offsets = [0, 40], sizes = [8, 8], strides = [1, 1]} : vector<8x64xf32> to vector<8x8xf32>
    %90 = arith.truncf %87 : vector<8x8xf32> to vector<8x8xbf16>
    %91 = arith.truncf %88 : vector<8x8xf32> to vector<8x8xbf16>
    %cst_32 = arith.constant dense<0.000000e+00> : vector<8x8xf32>
    %92 = tpu.matmul %90, %91, %cst_32 {dimension_numbers = #tpu.dot_dimension_numbers<[1], [1], [0], [0], [0, 0, 1, 0], [], []>} : vector<8x8xbf16>, vector<8x8xbf16>, vector<8x8xf32> -> vector<8x8xf32>
    %cst_33 = arith.constant -1.000000e+30 : f32
    %93 = vector.broadcast %cst_33 : f32 to vector<8x8xf32>
    %94 = arith.select %65, %93, %92 : vector<8x8xi1>, vector<8x8xf32>
    %cst_34 = arith.constant dense<0xFF800000> : vector<8xf32>
    %95 = vector.multi_reduction <maximumf>, %94, %cst_34 [1] : vector<8x8xf32> to vector<8xf32>
    %96 = vector.shape_cast %95 : vector<8xf32> to vector<8x1xf32>
    %97 = vector.broadcast %96 : vector<8x1xf32> to vector<8x8xf32>
    %98 = arith.subf %94, %97 : vector<8x8xf32>
    %99 = math.exp %98 : vector<8x8xf32>
    %cst_35 = arith.constant dense<0.000000e+00> : vector<8xf32>
    %100 = vector.multi_reduction <add>, %99, %cst_35 [1] : vector<8x8xf32> to vector<8xf32>
    %101 = vector.shape_cast %100 : vector<8xf32> to vector<8x1xf32>
    %102 = tpu.reciprocal %101 {approx = true} : vector<8x1xf32> -> vector<8x1xf32>
    %103 = vector.broadcast %102 : vector<8x1xf32> to vector<8x8xf32>
    %104 = arith.mulf %99, %103 : vector<8x8xf32>
    %105 = arith.truncf %104 : vector<8x8xf32> to vector<8x8xbf16>
    %106 = arith.truncf %89 : vector<8x8xf32> to vector<8x8xbf16>
    %cst_36 = arith.constant dense<0.000000e+00> : vector<8x8xf32>
    %107 = tpu.matmul %105, %106, %cst_36 {dimension_numbers = #tpu.dot_dimension_numbers<[1], [0], [0], [1], [0, 0, 1, 1], [], []>} : vector<8x8xbf16>, vector<8x8xbf16>, vector<8x8xf32> -> vector<8x8xf32>
    %108 = vector.extract_strided_slice %54 {offsets = [0, 16], sizes = [8, 8], strides = [1, 1]} : vector<8x32xf32> to vector<8x8xf32>
    %109 = vector.extract_strided_slice %60 {offsets = [0, 16], sizes = [8, 8], strides = [1, 1]} : vector<8x64xf32> to vector<8x8xf32>
    %110 = vector.extract_strided_slice %60 {offsets = [0, 48], sizes = [8, 8], strides = [1, 1]} : vector<8x64xf32> to vector<8x8xf32>
    %111 = arith.truncf %108 : vector<8x8xf32> to vector<8x8xbf16>
    %112 = arith.truncf %109 : vector<8x8xf32> to vector<8x8xbf16>
    %cst_37 = arith.constant dense<0.000000e+00> : vector<8x8xf32>
    %113 = tpu.matmul %111, %112, %cst_37 {dimension_numbers = #tpu.dot_dimension_numbers<[1], [1], [0], [0], [0, 0, 1, 0], [], []>} : vector<8x8xbf16>, vector<8x8xbf16>, vector<8x8xf32> -> vector<8x8xf32>
    %cst_38 = arith.constant -1.000000e+30 : f32
    %114 = vector.broadcast %cst_38 : f32 to vector<8x8xf32>
    %115 = arith.select %65, %114, %113 : vector<8x8xi1>, vector<8x8xf32>
    %cst_39 = arith.constant dense<0xFF800000> : vector<8xf32>
    %116 = vector.multi_reduction <maximumf>, %115, %cst_39 [1] : vector<8x8xf32> to vector<8xf32>
    %117 = vector.shape_cast %116 : vector<8xf32> to vector<8x1xf32>
    %118 = vector.broadcast %117 : vector<8x1xf32> to vector<8x8xf32>
    %119 = arith.subf %115, %118 : vector<8x8xf32>
    %120 = math.exp %119 : vector<8x8xf32>
    %cst_40 = arith.constant dense<0.000000e+00> : vector<8xf32>
    %121 = vector.multi_reduction <add>, %120, %cst_40 [1] : vector<8x8xf32> to vector<8xf32>
    %122 = vector.shape_cast %121 : vector<8xf32> to vector<8x1xf32>
    %123 = tpu.reciprocal %122 {approx = true} : vector<8x1xf32> -> vector<8x1xf32>
    %124 = vector.broadcast %123 : vector<8x1xf32> to vector<8x8xf32>
    %125 = arith.mulf %120, %124 : vector<8x8xf32>
    %126 = arith.truncf %125 : vector<8x8xf32> to vector<8x8xbf16>
    %127 = arith.truncf %110 : vector<8x8xf32> to vector<8x8xbf16>
    %cst_41 = arith.constant dense<0.000000e+00> : vector<8x8xf32>
    %128 = tpu.matmul %126, %127, %cst_41 {dimension_numbers = #tpu.dot_dimension_numbers<[1], [0], [0], [1], [0, 0, 1, 1], [], []>} : vector<8x8xbf16>, vector<8x8xbf16>, vector<8x8xf32> -> vector<8x8xf32>
    %129 = vector.extract_strided_slice %54 {offsets = [0, 24], sizes = [8, 8], strides = [1, 1]} : vector<8x32xf32> to vector<8x8xf32>
    %130 = vector.extract_strided_slice %60 {offsets = [0, 24], sizes = [8, 8], strides = [1, 1]} : vector<8x64xf32> to vector<8x8xf32>
    %131 = vector.extract_strided_slice %60 {offsets = [0, 56], sizes = [8, 8], strides = [1, 1]} : vector<8x64xf32> to vector<8x8xf32>
    %132 = arith.truncf %129 : vector<8x8xf32> to vector<8x8xbf16>
    %133 = arith.truncf %130 : vector<8x8xf32> to vector<8x8xbf16>
    %cst_42 = arith.constant dense<0.000000e+00> : vector<8x8xf32>
    %134 = tpu.matmul %132, %133, %cst_42 {dimension_numbers = #tpu.dot_dimension_numbers<[1], [1], [0], [0], [0, 0, 1, 0], [], []>} : vector<8x8xbf16>, vector<8x8xbf16>, vector<8x8xf32> -> vector<8x8xf32>
    %cst_43 = arith.constant -1.000000e+30 : f32
    %135 = vector.broadcast %cst_43 : f32 to vector<8x8xf32>
    %136 = arith.select %65, %135, %134 : vector<8x8xi1>, vector<8x8xf32>
    %cst_44 = arith.constant dense<0xFF800000> : vector<8xf32>
    %137 = vector.multi_reduction <maximumf>, %136, %cst_44 [1] : vector<8x8xf32> to vector<8xf32>
    %138 = vector.shape_cast %137 : vector<8xf32> to vector<8x1xf32>
    %139 = vector.broadcast %138 : vector<8x1xf32> to vector<8x8xf32>
    %140 = arith.subf %136, %139 : vector<8x8xf32>
    %141 = math.exp %140 : vector<8x8xf32>
    %cst_45 = arith.constant dense<0.000000e+00> : vector<8xf32>
    %142 = vector.multi_reduction <add>, %141, %cst_45 [1] : vector<8x8xf32> to vector<8xf32>
    %143 = vector.shape_cast %142 : vector<8xf32> to vector<8x1xf32>
    %144 = tpu.reciprocal %143 {approx = true} : vector<8x1xf32> -> vector<8x1xf32>
    %145 = vector.broadcast %144 : vector<8x1xf32> to vector<8x8xf32>
    %146 = arith.mulf %141, %145 : vector<8x8xf32>
    %147 = arith.truncf %146 : vector<8x8xf32> to vector<8x8xbf16>
    %148 = arith.truncf %131 : vector<8x8xf32> to vector<8x8xbf16>
    %cst_46 = arith.constant dense<0.000000e+00> : vector<8x8xf32>
    %149 = tpu.matmul %147, %148, %cst_46 {dimension_numbers = #tpu.dot_dimension_numbers<[1], [0], [0], [1], [0, 0, 1, 1], [], []>} : vector<8x8xbf16>, vector<8x8xbf16>, vector<8x8xf32> -> vector<8x8xf32>
    %150 = tpu.concatenate %86, %107, %128, %149 in 1 : vector<8x8xf32>, vector<8x8xf32>, vector<8x8xf32>, vector<8x8xf32> -> vector<8x32xf32>
    %c0_47 = arith.constant 0 : index
    %c0_48 = arith.constant 0 : index
    %151 = vector.load %arg9[%c0_47, %c0_48] : memref<32x32xbf16, #tpu.memory_space<vmem>>, vector<32x32xbf16>
    %152 = arith.truncf %150 : vector<8x32xf32> to vector<8x32xbf16>
    %cst_49 = arith.constant dense<0.000000e+00> : vector<8x32xf32>
    %153 = tpu.matmul %152, %151, %cst_49 {dimension_numbers = #tpu.dot_dimension_numbers<[1], [0], [0], [1], [0, 0, 1, 1], [], []>} : vector<8x32xbf16>, vector<32x32xbf16>, vector<8x32xf32> -> vector<8x32xf32>
    %c0_50 = arith.constant 0 : index
    %c0_51 = arith.constant 0 : index
    %154 = vector.load %arg10[%c0_50, %c0_51] : memref<1x32xf32, #tpu.memory_space<vmem>>, vector<1x32xf32>
    %155 = vector.broadcast %154 : vector<1x32xf32> to vector<8x32xf32>
    %156 = arith.addf %153, %155 : vector<8x32xf32>
    %157 = arith.addf %8, %156 : vector<8x32xf32>
    %c0_52 = arith.constant 0 : index
    %c0_53 = arith.constant 0 : index
    %158 = vector.load %arg11[%c0_52, %c0_53] : memref<1x32xf32, #tpu.memory_space<vmem>>, vector<1x32xf32>
    %c0_54 = arith.constant 0 : index
    %c0_55 = arith.constant 0 : index
    %159 = vector.load %arg12[%c0_54, %c0_55] : memref<1x32xf32, #tpu.memory_space<vmem>>, vector<1x32xf32>
    %cst_56 = arith.constant dense<0.000000e+00> : vector<8xf32>
    %160 = vector.multi_reduction <add>, %157, %cst_56 [1] : vector<8x32xf32> to vector<8xf32>
    %161 = vector.shape_cast %160 : vector<8xf32> to vector<8x1xf32>
    %cst_57 = arith.constant 3.200000e+01 : f32
    %162 = vector.broadcast %cst_57 : f32 to vector<8x1xf32>
    %163 = arith.divf %161, %162 : vector<8x1xf32>
    %164 = vector.broadcast %163 : vector<8x1xf32> to vector<8x32xf32>
    %165 = arith.subf %157, %164 : vector<8x32xf32>
    %166 = arith.mulf %165, %165 : vector<8x32xf32>
    %cst_58 = arith.constant dense<0.000000e+00> : vector<8xf32>
    %167 = vector.multi_reduction <add>, %166, %cst_58 [1] : vector<8x32xf32> to vector<8xf32>
    %168 = vector.shape_cast %167 : vector<8xf32> to vector<8x1xf32>
    %cst_59 = arith.constant 3.200000e+01 : f32
    %169 = vector.broadcast %cst_59 : f32 to vector<8x1xf32>
    %170 = arith.divf %168, %169 : vector<8x1xf32>
    %cst_60 = arith.constant 9.99999974E-6 : f32
    %171 = vector.broadcast %cst_60 : f32 to vector<8x1xf32>
    %172 = arith.addf %170, %171 : vector<8x1xf32>
    %173 = math.rsqrt %172 : vector<8x1xf32>
    %174 = vector.broadcast %173 : vector<8x1xf32> to vector<8x32xf32>
    %175 = arith.mulf %165, %174 : vector<8x32xf32>
    %176 = vector.broadcast %158 : vector<1x32xf32> to vector<8x32xf32>
    %177 = arith.mulf %175, %176 : vector<8x32xf32>
    %178 = vector.broadcast %159 : vector<1x32xf32> to vector<8x32xf32>
    %179 = arith.addf %177, %178 : vector<8x32xf32>
    %c0_61 = arith.constant 0 : index
    %c0_62 = arith.constant 0 : index
    %180 = vector.load %arg13[%c0_61, %c0_62] : memref<32x128xbf16, #tpu.memory_space<vmem>>, vector<32x128xbf16>
    %181 = arith.truncf %179 : vector<8x32xf32> to vector<8x32xbf16>
    %cst_63 = arith.constant dense<0.000000e+00> : vector<8x128xf32>
    %182 = tpu.matmul %181, %180, %cst_63 {dimension_numbers = #tpu.dot_dimension_numbers<[1], [0], [0], [1], [0, 0, 1, 1], [], []>} : vector<8x32xbf16>, vector<32x128xbf16>, vector<8x128xf32> -> vector<8x128xf32>
    %c0_64 = arith.constant 0 : index
    %c0_65 = arith.constant 0 : index
    %183 = vector.load %arg14[%c0_64, %c0_65] : memref<1x128xf32, #tpu.memory_space<vmem>>, vector<1x128xf32>
    %184 = vector.broadcast %183 : vector<1x128xf32> to vector<8x128xf32>
    %185 = arith.addf %182, %184 : vector<8x128xf32>
    %cst_66 = arith.constant 1.702000e+00 : f32
    %186 = vector.broadcast %cst_66 : f32 to vector<8x128xf32>
    %187 = arith.mulf %186, %185 : vector<8x128xf32>
    %188 = arith.negf %187 : vector<8x128xf32>
    %189 = math.exp %188 : vector<8x128xf32>
    %cst_67 = arith.constant 1.000000e+00 : f32
    %190 = vector.broadcast %cst_67 : f32 to vector<8x128xf32>
    %191 = arith.addf %190, %189 : vector<8x128xf32>
    %192 = arith.divf %190, %191 : vector<8x128xf32>
    %193 = arith.mulf %185, %192 : vector<8x128xf32>
    %c0_68 = arith.constant 0 : index
    %c0_69 = arith.constant 0 : index
    %194 = vector.load %arg15[%c0_68, %c0_69] : memref<128x32xbf16, #tpu.memory_space<vmem>>, vector<128x32xbf16>
    %195 = arith.truncf %193 : vector<8x128xf32> to vector<8x128xbf16>
    %cst_70 = arith.constant dense<0.000000e+00> : vector<8x32xf32>
    %196 = tpu.matmul %195, %194, %cst_70 {dimension_numbers = #tpu.dot_dimension_numbers<[1], [0], [0], [1], [0, 0, 1, 1], [], []>} : vector<8x128xbf16>, vector<128x32xbf16>, vector<8x32xf32> -> vector<8x32xf32>
    %c0_71 = arith.constant 0 : index
    %c0_72 = arith.constant 0 : index
    %197 = vector.load %arg16[%c0_71, %c0_72] : memref<1x32xf32, #tpu.memory_space<vmem>>, vector<1x32xf32>
    %198 = vector.broadcast %197 : vector<1x32xf32> to vector<8x32xf32>
    %199 = arith.addf %196, %198 : vector<8x32xf32>
    %200 = arith.addf %157, %199 : vector<8x32xf32>
    %c0_73 = arith.constant 0 : index
    %c0_74 = arith.constant 0 : index
    %c0_75 = arith.constant 0 : index
    %201 = vector.load %arg17[%c0_73, %c0_74, %c0_75] : memref<1x8x32xf32, #tpu.memory_space<vmem>>, vector<1x8x32xf32>
    %202 = vector.shape_cast %201 : vector<1x8x32xf32> to vector<8x32xf32>
    %203 = vector.shape_cast %200 : vector<8x32xf32> to vector<1x8x32xf32>
    tpu.vector_store %arg17[%c0_73, %c0_74, %c0_75], %203 {strides = array<i32>} : memref<1x8x32xf32, #tpu.memory_space<vmem>>, vector<1x8x32xf32>,
    return
  }
  func.func @transform_0(%arg0: i32, %arg1: i32) -> (i32, i32, i32) {
    %c0_i32 = arith.constant 0 : i32
    %c0_i32_0 = arith.constant 0 : i32
    %c0_i32_1 = arith.constant 0 : i32
    return %arg0, %c0_i32, %c0_i32_0 : i32, i32, i32
  }
  func.func @transform_1(%arg0: i32, %arg1: i32) -> (i32, i32) {
    %c0_i32 = arith.constant 0 : i32
    %c0_i32_0 = arith.constant 0 : i32
    %c0_i32_1 = arith.constant 0 : i32
    return %c0_i32, %c0_i32_0 : i32, i32
  }
  func.func @transform_2(%arg0: i32, %arg1: i32) -> (i32, i32) {
    %c0_i32 = arith.constant 0 : i32
    %c0_i32_0 = arith.constant 0 : i32
    %c0_i32_1 = arith.constant 0 : i32
    return %c0_i32, %c0_i32_0 : i32, i32
  }
  func.func @transform_3(%arg0: i32, %arg1: i32) -> (i32, i32) {
    %c0_i32 = arith.constant 0 : i32
    %c0_i32_0 = arith.constant 0 : i32
    %c0_i32_1 = arith.constant 0 : i32
    return %c0_i32, %c0_i32_0 : i32, i32
  }
  func.func @transform_4(%arg0: i32, %arg1: i32) -> (i32, i32) {
    %c0_i32 = arith.constant 0 : i32
    %c0_i32_0 = arith.constant 0 : i32
    %c0_i32_1 = arith.constant 0 : i32
    return %c0_i32, %c0_i32_0 : i32, i32
  }
  func.func @transform_5(%arg0: i32, %arg1: i32) -> (i32, i32) {
    %c0_i32 = arith.constant 0 : i32
    %c0_i32_0 = arith.constant 0 : i32
    %c0_i32_1 = arith.constant 0 : i32
    return %c0_i32, %c0_i32_0 : i32, i32
  }
  func.func @transform_6(%arg0: i32, %arg1: i32) -> (i32, i32) {
    %c0_i32 = arith.constant 0 : i32
    %c0_i32_0 = arith.constant 0 : i32
    %c0_i32_1 = arith.constant 0 : i32
    return %c0_i32, %c0_i32_0 : i32, i32
  }
  func.func @transform_7(%arg0: i32, %arg1: i32) -> (i32, i32) {
    %c0_i32 = arith.constant 0 : i32
    %c0_i32_0 = arith.constant 0 : i32
    %c0_i32_1 = arith.constant 0 : i32
    return %c0_i32, %c0_i32_0 : i32, i32
  }
  func.func @transform_8(%arg0: i32, %arg1: i32) -> (i32, i32) {
    %c0_i32 = arith.constant 0 : i32
    %c0_i32_0 = arith.constant 0 : i32
    %c0_i32_1 = arith.constant 0 : i32
    return %c0_i32, %c0_i32_0 : i32, i32
  }
  func.func @transform_9(%arg0: i32, %arg1: i32) -> (i32, i32) {
    %c0_i32 = arith.constant 0 : i32
    %c0_i32_0 = arith.constant 0 : i32
    %c0_i32_1 = arith.constant 0 : i32
    return %c0_i32, %c0_i32_0 : i32, i32
  }
  func.func @transform_10(%arg0: i32, %arg1: i32) -> (i32, i32) {
    %c0_i32 = arith.constant 0 : i32
    %c0_i32_0 = arith.constant 0 : i32
    %c0_i32_1 = arith.constant 0 : i32
    return %c0_i32, %c0_i32_0 : i32, i32
  }
  func.func @transform_11(%arg0: i32, %arg1: i32) -> (i32, i32) {
    %c0_i32 = arith.constant 0 : i32
    %c0_i32_0 = arith.constant 0 : i32
    %c0_i32_1 = arith.constant 0 : i32
    return %c0_i32, %c0_i32_0 : i32, i32
  }
  func.func @transform_12(%arg0: i32, %arg1: i32) -> (i32, i32) {
    %c0_i32 = arith.constant 0 : i32
    %c0_i32_0 = arith.constant 0 : i32
    %c0_i32_1 = arith.constant 0 : i32
    return %c0_i32, %c0_i32_0 : i32, i32
  }
  func.func @transform_13(%arg0: i32, %arg1: i32) -> (i32, i32) {
    %c0_i32 = arith.constant 0 : i32
    %c0_i32_0 = arith.constant 0 : i32
    %c0_i32_1 = arith.constant 0 : i32
    return %c0_i32, %c0_i32_0 : i32, i32
  }
  func.func @transform_14(%arg0: i32, %arg1: i32) -> (i32, i32) {
    %c0_i32 = arith.constant 0 : i32
    %c0_i32_0 = arith.constant 0 : i32
    %c0_i32_1 = arith.constant 0 : i32
    return %c0_i32, %c0_i32_0 : i32, i32
  }
  func.func @transform_15(%arg0: i32, %arg1: i32) -> (i32, i32, i32) {
    %c0_i32 = arith.constant 0 : i32
    %c0_i32_0 = arith.constant 0 : i32
    return %arg0, %arg1, %c0_i32 : i32, i32, i32
  }
}

</mosaic_0001>

<bundles_post_ra>
// kernel: tpu_custom_call.1
= control target key start
LH: loop header
LB: loop body
LE: loop exit
PB: predicated region body
PF: predicated region fallthrough
CT: control target
= control target key end

     0   :  { %s2295_s0 = inlined_call_operand.vmem [shape: f32[2,8,32], index: 0, kind: input, shape index: {}]   ;;  %s2296_s1 = inlined_call_operand.vmem [shape: f32[1,32], index: 1, kind: input, shape index: {}]   ;;  %s2297_s2 = inlined_call_operand.vmem [shape: f32[1,32], index: 2, kind: input, shape index: {}]   ;;  %s2298_s3 = inlined_call_operand.vmem [shape: bf16[32,32], index: 3, kind: input, shape index: {}]   ;;  %s2299_s4 = inlined_call_operand.vmem [shape: f32[1,32], index: 4, kind: input, shape index: {}]   ;;  %s2300_s5 = inlined_call_operand.vmem [shape: bf16[32,64], index: 5, kind: input, shape index: {}]   ;;  %s2301_s6 = inlined_call_operand.vmem [shape: f32[1,64], index: 6, kind: input, shape index: {}]   ;;  %s2302_s7 = inlined_call_operand.vmem [shape: bf16[32,32], index: 7, kind: input, shape index: {}]   ;;  %s2303_s8 = inlined_call_operand.vmem [shape: f32[1,32], index: 8, kind: input, shape index: {}]   ;;  %s2304_s9 = inlined_call_operand.vmem [shape: f32[1,32], index: 9, kind: input, shape index: {}]   ;;  %s2305_s10 = inlined_call_operand.vmem [shape: f32[1,32], index: 10, kind: input, shape index: {}]   ;;  %s2306_s11 = inlined_call_operand.vmem [shape: bf16[32,128], index: 11, kind: input, shape index: {}]   ;;  %s2307_s12 = inlined_call_operand.vmem [shape: f32[1,128], index: 12, kind: input, shape index: {}]   ;;  %s2308_s13 = inlined_call_operand.vmem [shape: bf16[128,32], index: 13, kind: input, shape index: {}]   ;;  %s2309_s14 = inlined_call_operand.vmem [shape: f32[1,32], index: 14, kind: input, shape index: {}]   ;;  %s2310_s15 = inlined_call_operand.hbm [shape: f32[2,8,32], index: 15, kind: output, shape index: {}]  }
   0x1   :  { %2313 = sst [smem:[#allocation7_spill]] %s2295_s0 }
   0x2   :  { %2314 = sst [smem:[#allocation8_spill]] %s2296_s1 }
   0x3   :  { %2315 = sst [smem:[#allocation9_spill]] %s2297_s2 }
   0x4   :  { %2316 = sst [smem:[#allocation10_spill]] %s2298_s3 }
   0x5   :  { %20 = vsyncpa [#allocation3], 0 }
   0x6   :  { %22 = vsyncpa [#allocation3 + $0x1], 0  ;;  %s1998_s18 = smov 0   ;;  %s2000_s19 = smov 0  }
   0x7   :  { %s2002_s20 = smov 0   ;;  %s2004_s21 = smov 0  }
   0x8   :  { %s2006_s22 = smov 0   ;;  %s2008_s23 = smov 0  }
   0x9 LB: > { %2317 = sst [smem:[#allocation5_spill]] %s1883_s18  ;;  %s1530_s24 = sadd.s32 4294967295, %s1903_s23   ;;  %s1903_s23 = sphi %s2008_s23, %s28_s23   ;;  %s1899_s22 = sphi %s2006_s22, %s2331_s22   ;;  %s1895_s21 = sphi %s2004_s21, %s2330_s21   ;;  %s1891_s20 = sphi %s2002_s20, %s2329_s20   ;;  %s1887_s19 = sphi %s2000_s19, %s2328_s19   ;;  %s1883_s18 = sphi %s1998_s18, %s2327_s18  }
   0xa   : > { %s1531_s25 = sadd.s32 4294967294, %s1903_s23   ;;  %s40_s26 = sadd.s32 1, %s1899_s22 }
   0xb   : > { %s369_s27 = sadd.s32 1, %s1891_s20  ;;  %p42_p0 = scmp.ge.s32.totalorder %s40_s26, 2 }
   0xc   : > { %p379_p1 = scmp.ne.s32.totalorder %s1891_s20, %s1887_s19  ;;  %p380_p2 = scmp.eq.s32.totalorder %s1530_s24, 1 }
   0xd   : > { %p385_p3 = scmp.ne.s32.totalorder %s1887_s19, %s1883_s18  ;;  %s2333_s26 = smov (%p42_p0, %s40_s26), 0 }
   0xe   : > { %2318 = sst [smem:[#allocation6_spill]] %s2333_s26  ;;  %p2038_p4 = por %p380_p2, %p379_p1 }
   0xf   : > { %p386_p5 = scmp.eq.s32.totalorder %s1531_s25, 1  ;;  %s364_s29 = ssub.s32 %s1899_s22, %s2333_s26 }
  0x10   : > { %p1534_p6 = scmp.ge.s32.totalorder %s1903_s23, 1  ;;  %p367_p7 = scmp.eq.s32.totalorder %s364_s29, 0 }
  0x11   : > { %p2045_p8 = por %p386_p5, %p385_p3  ;;  %p453_p9 = scmp.lt.s32.totalorder %s1903_s23, 3 }
  0x12   : > { %s2051_s16 = scalar_select %p367_p7, %s1891_s20, %s369_s27  }
  0x13   : > { %p454_p10 = pnand %p1534_p6, %p453_p9 }
  0x14   : > { %p500_p11 = scmp.lt.s32.totalorder (!%p454_p10), %s1895_s21, 1  ;;  %vm511_vm0 = vcmask (!%p454_p10), 261120   ;;  %s2321_s0 = sld [smem:[#allocation7_spill]] (!%p454_p10)  ;;  %v1905_v13 = vmov (!%p454_p10), 0.0   ;;  %vm1906_vm1 = vmmov (!%p454_p10), 0   ;;  %v1785_v29 = vld [vmem:[%s2300_s5] sm:$0xff] (!%p454_p10)   ;;  %v689_v59 = vlaneseq (!%p454_p10) }
  0x15   : > { %457 = sbr.rel (%p454_p10) target bundleno = 2618 (0xa3a), region = 80  ;;  %s2322_s3 = sld [smem:[#allocation10_spill]] (!%p454_p10)  ;;  %1616 = vmatprep.subr.bf16.mxu1 (!%p454_p10), %v1905_v13  ;;  %1644 = vmatprep.subr.bf16.mxu0 (!%p454_p10), %v1905_v13  ;;  %v1786_v32 = vld [vmem:[%s2300_s5 + $0x8] sm:$0xff] (!%p454_p10)   ;;  %v1539_v35 = vld [vmem:[%s2299_s4] ss:$0 sm:$0xff] (!%p454_p10)  ;;  %vm698_vm2 = vcmask (!%p454_p10), 64512  }
  0x16   : > { %1620 = vmatprep.mubr.msk.bf16.mxu1 (!%p454_p10), %vm1906_vm1, %v1905_v13  ;;  %1646 = vmatprep.mubr.msk.bf16.mxu0 (!%p454_p10), %vm1906_vm1, %v1905_v13  ;;  %s2323_s1 = sld [smem:[#allocation8_spill]] (!%p454_p10)  ;;  %s2324_s2 = sld [smem:[#allocation9_spill]] (!%p454_p10)  ;;  %v1543_v42 = vld [vmem:[%s2301_s6] ss:$0 sm:$0xff] (!%p454_p10)  ;;  %v690_v60 = vshrl.u32 (!%p454_p10), %v689_v59, 7  ;;  %v694_v61 = vand.u32 (!%p454_p10), 127, %v689_v59 }
  0x17   : > { %s1907_s18 = smov (!%p454_p10), 120   ;;  %s1908_s29 = smov (!%p454_p10), 112   ;;  %vm764_vm4 = vcmask (!%p454_p10), 1043456   ;;  %vm1155_vm5 = vcmask (!%p454_p10), 130048   ;;  %vm1157_vm6 = vcmask (!%p454_p10), 195584  }
  0x18   : > { %vm695_vm3 = vcmp.gt.s32.totalorder (!%p454_p10), %v694_v61, %v690_v60  ;;  %s1911_s25 = smov (!%p454_p10), 80   ;;  %s1917_s27 = smov (!%p454_p10), [#allocation2]  }
  0x1b   : > { %v1783_v12 = vld [vmem:[%s2322_s3] sm:$0xff] (!%p454_p10)   ;;  %v1784_v14 = vld [vmem:[%s2322_s3 + $0x8] sm:$0xff] (!%p454_p10)  }
  0x1c   : > { %s501_s17 = scalar_select %p500_p11, %s1895_s21, 1  ;;  %1617 = vmatpush3.bf16.msra.mxu1 %v1783_v12  ;;  %v1537_v22 = vld [vmem:[%s2323_s1] ss:$0 sm:$0xff] }
  0x1d   : > { %1618 = vmatprep.subr.bf16.mxu1 %v1905_v13  ;;  %v1538_v24 = vld [vmem:[%s2324_s2] ss:$0 sm:$0xff] }
  0x1e   : > { %s1536_s24 = sshll.u32 %s501_s17, 3  ;;  %s1909_s17 = smov 104  }
  0x1f   : > { %s503_s26 = scalar_lea.vmem %s2321_s0, %s1536_s24  ;;  %s1910_s24 = smov 88  }
  0x20   : > { %v2058_v0 = vld [vmem:[%s503_s26] sm:$0xff]  ;;  %1619 = vmatpush3.bf16.msra.mxu1 %v1784_v14  ;;  %s1913_s26 = smov 72  }
  0x21   : > { %v540_v1 = vsel %vm511_vm0, %v2058_v0, 0.0  ;;  %1624 = vmatprep.subr.bf16.mxu1 %v1905_v13 }
  0x22   : > { %541 = vadd.xlane.f32.xlu0 %v540_v1 }
  0x26   : > { %513 = vadd.xlane.f32.xlu0 %v540_v1 }
  0xaf   : > { %v542_v2 = vpop.xlane.xlu0 %541 }
  0xb0   : > { %v543_v3 = vmul.f32 0.03125, %v542_v2 }
  0xb2   : > { %v544_v4 = vsub.f32 %v2058_v0, %v543_v3 }
  0xb3   : > { %v514_v5 = vpop.xlane.xlu0 %513 }
  0xb4   : > { %v516_v6 = vmul.f32 0.03125, %v514_v5  ;;  %v545_v7 = vmul.f32 %v544_v4, %v544_v4 }
  0xb6   : > { %v517_v8 = vsub.f32 %v2058_v0, %v516_v6  ;;  %v546_v9 = vsel %vm511_vm0, %v545_v7, 0.0 }
  0xb7   : > { %547 = vadd.xlane.f32.xlu1 %v546_v9 }
  0xb8   : > { %v518_v10 = vmul.f32 %v517_v8, %v517_v8 }
  0xba   : > { %v519_v11 = vsel %vm511_vm0, %v518_v10, 0.0 }
  0xbb   : > { %520 = vadd.xlane.f32.xlu1 %v519_v11 }
 0x144   : > { %v548_v15 = vpop.xlane.xlu1 %547 }
 0x145   : > { %v549_v16 = vmul.f32 0.03125, %v548_v15 }
 0x147   : > { %v550_v17 = vadd.f32 1e-05, %v549_v16 }
 0x148   : > { %v521_v18 = vpop.xlane.xlu1 %520 }
 0x149   : > { %1799 = vrsqrt.f32 %v550_v17  ;;  %v522_v19 = vmul.f32 0.03125, %v521_v18 }
 0x14b   : > { %v523_v20 = vadd.f32 1e-05, %v522_v19 }
 0x14d   : > { %1801 = vrsqrt.f32 %v523_v20 }
 0x153   : > { %v1800_v21 = vpop.eup %1799 }
 0x154   : > { %v552_v23 = vmul.f32 %v1800_v21, %v544_v4 }
 0x156   : > { %v553_v25 = vmul.f32 %v1537_v22, %v552_v23 }
 0x157   : > { %v1802_v26 = vpop.eup %1801 }
 0x158   : > { %v525_v27 = vmul.f32 %v1802_v26, %v517_v8  ;;  %v554_v28 = vadd.f32 %v1538_v24, %v553_v25 }
 0x15a   : > { %v532_v30 = vmul.f32 %v1537_v22, %v525_v27  ;;  %v559_v31 = vpack.c.bf16 %v554_v28, %v554_v28 }
 0x15c   : > { %1621 = vmatmul.mubr.msk.bf16.vlgmr.msra.gmra.mrb[0].mxu1 %vm511_vm0, %v559_v31  ;;  %v539_v33 = vadd.f32 %v1538_v24, %v532_v30 }
 0x15d   : > { %1625 = vmatpush3.bf16.msra.mxu1 %v1785_v29  ;;  %1628 = vmatprep.mubr.msk.bf16.mxu1 %vm1906_vm1, %v1905_v13 }
 0x15e   : > { %1626 = vmatprep.subr.bf16.mxu1 %v1905_v13  ;;  %v626_v34 = vpack.c.bf16 %v539_v33, %v539_v33 }
 0x161   : > { %1627 = vmatpush3.bf16.msra.mxu1 %v1786_v32 }
 0x162   : > { %1632 = vmatprep.subr.bf16.mxu1 %v1905_v13 }
 0x164   : > { %1629 = vmatmul.mubr.msk.bf16.vlgmr.msra.gmra.mrb[4].mxu1 %vm511_vm0, %v626_v34 }
 0x165   : > { %1634 = vmatprep.mubr.msk.bf16.mxu1 %vm1906_vm1, %v1905_v13 }
 0x22f   : > { %v616_v36 = vpop.f32.mrb[0].mxu1 }
 0x230   : > { %v617_v37 = vadd.f32 %v1539_v35, %v616_v36  ;;  %v1622_v38 = vpop.f32.mrb[1].mxu1 }
 0x231   : > { %v619_v39 = vpop.f32.mrb[2].mxu1 }
 0x232   : > { %v696_v40 = vpack.c.bf16 %v617_v37, %v617_v37  ;;  %v1623_v41 = vpop.f32.mrb[3].mxu1 }
 0x234   : > { %809 = vrot.lane.b32.xlu1 %v696_v40, %s1907_s18 }
 0x237   : > { %v683_v43 = vpop.f32.mrb[4].mxu1 }
 0x238   : > { %v684_v44 = vadd.f32 %v1543_v42, %v683_v43  ;;  %v1630_v45 = vpop.f32.mrb[5].mxu1 }
 0x239   : > { %v686_v46 = vpop.f32.mrb[6].mxu1 }
 0x23a   : > { %v2106_v47 = vpack.c.bf16 %v684_v44, %v684_v44  ;;  %v1631_v48 = vpop.f32.mrb[7].mxu1 }
 0x23c   : > { %922 = vrot.lane.b32.xlu1 %v2106_v47, %s1908_s29  ;;  %811 = vrot.lane.b32.xlu0 %v2106_v47, %s1907_s18  ;;  %v703_v49 = vsel %vm698_vm2, %v2106_v47, 0  ;;  %s1912_s18 = smov 96  }
 0x23d   : > { %1633 = vmatpush3.bf16.xpose.msra.mxu1 %v703_v49 }
 0x23e   : > { %1638 = vmatprep.subr.bf16.mxu1 %v1905_v13 }
 0x240   : > { %920 = vrot.lane.b32.xlu1 %v696_v40, %s1908_s29  ;;  %1033 = vrot.lane.b32.xlu0 %v2106_v47, %s1909_s17  ;;  %s1829_s29 = sshll.u32 %s1917_s27, 4  ;;  %s1830_s29 = int_to_ptr.vmem [resolvable:$false] %s1829_s29 }
 0x241   : > { %s1831_s3 = scalar_lea.vmem %s1830_s29, 256 }
 0x244   : > { %1031 = vrot.lane.b32.xlu1 %v696_v40, %s1909_s17  ;;  %1635 = vmatmul.mubr.msk.bf16.vlgmr.msra.gmra.mrb[8].mxu1 %vm698_vm2, %v696_v40  ;;  %s1576_s17 = sshll.u32 %s1895_s21, 7 }
 0x245   : > { %1640 = vmatprep.mubr.msk.bf16.mxu1 %vm1906_vm1, %v1905_v13  ;;  %s2247_s2 = scalar_lea.hbm %s2310_s15, %s1576_s17 }
 0x2a6   : > { %v810_v52 = vpop.permute.xlu1 %809 }
 0x2ae   : > { %v812_v50 = vpop.permute.xlu0 %811  ;;  %v923_v53 = vpop.permute.xlu1 %922 }
 0x2af   : > { %v817_v51 = vsel %vm698_vm2, %v812_v50, 0  ;;  %v928_v54 = vsel %vm698_vm2, %v923_v53, 0 }
 0x2b0   : > { %1645 = vmatpush3.bf16.xpose.msra.mxu0 %v817_v51 }
 0x2b1   : > { %1656 = vmatprep.subr.bf16.mxu0 %v1905_v13 }
 0x2b2   : > { %v1034_v55 = vpop.permute.xlu0 %1033  ;;  %v921_v56 = vpop.permute.xlu1 %920 }
 0x2b3   : > { %v1039_v57 = vsel %vm698_vm2, %v1034_v55, 0 }
 0x2b6   : > { %v1032_v58 = vpop.permute.xlu1 %1031 }
 0x2b7   : > { %1647 = vmatmul.mubr.msk.bf16.vlgmr.msra.gmra.mrb[0].mxu0 %vm698_vm2, %v810_v52 }
 0x2b8   : > { %1657 = vmatpush3.bf16.xpose.msra.mxu0 %v928_v54  ;;  %1658 = vmatprep.mubr.msk.bf16.mxu0 %vm1906_vm1, %v1905_v13 }
 0x2b9   : > { %1668 = vmatprep.subr.bf16.mxu0 %v1905_v13 }
 0x2bf   : > { %1659 = vmatmul.mubr.msk.bf16.vlgmr.msra.gmra.mrb[4].mxu0 %vm698_vm2, %v921_v56 }
 0x2c0   : > { %1669 = vmatpush3.bf16.xpose.msra.mxu0 %v1039_v57  ;;  %1670 = vmatprep.mubr.msk.bf16.mxu0 %vm1906_vm1, %v1905_v13 }
 0x2c1   : > { %1680 = vmatprep.subr.bf16.mxu0 %v1905_v13 }
 0x2c7   : > { %1671 = vmatmul.mubr.msk.bf16.vlgmr.msra.gmra.mrb[8].mxu0 %vm698_vm2, %v1032_v58 }
 0x2c8   : > { %1684 = vmatprep.mubr.msk.bf16.mxu0 %vm1906_vm1, %v1905_v13 }
 0x317   : > { %v739_v62 = vpop.f32.mrb[8].mxu1 }
 0x318   : > { %v745_v63 = vsel %vm695_vm3, -1e+30, %v739_v62  ;;  %v1636_v1 = vpop.f32.mrb[9].mxu1 }
 0x319   : > { %v742_v2 = vpop.f32.mrb[10].mxu1  ;;  %v746_v3 = vsel %vm698_vm2, %v745_v63, -inf }
 0x31a   : > { %747 = vmax.xlane.f32.xlu0 %v746_v3  ;;  %v1637_v4 = vpop.f32.mrb[11].mxu1 }
 0x38a   : > { %v853_v5 = vpop.f32.mrb[0].mxu0 }
 0x38b   : > { %v859_v6 = vsel %vm695_vm3, -1e+30, %v853_v5  ;;  %v1648_v7 = vpop.f32.mrb[1].mxu0 }
 0x38c   : > { %v856_v8 = vpop.f32.mrb[2].mxu0  ;;  %v860_v9 = vsel %vm698_vm2, %v859_v6, -inf }
 0x38d   : > { %861 = vmax.xlane.f32.xlu1 %v860_v9  ;;  %v1649_v10 = vpop.f32.mrb[3].mxu0  ;;  %v1787_v9 = vld [vmem:[%s2302_s7] sm:$0xff]  }
 0x38e   : > { %1681 = vmatpush3.bf16.msra.mxu0 %v1787_v9  ;;  %v1788_v10 = vld [vmem:[%s2302_s7 + $0x8] sm:$0xff]  }
 0x38f   : > { %1682 = vmatprep.subr.bf16.mxu0 %v1905_v13 }
 0x392   : > { %v964_v11 = vpop.f32.mrb[4].mxu0  ;;  %1683 = vmatpush3.bf16.msra.mxu0 %v1788_v10 }
 0x393   : > { %v970_v12 = vsel %vm695_vm3, -1e+30, %v964_v11  ;;  %v1660_v14 = vpop.f32.mrb[5].mxu0  ;;  %1696 = vmatprep.subr.bf16.mxu0 %v1905_v13 }
 0x394   : > { %v967_v15 = vpop.f32.mrb[6].mxu0  ;;  %v971_v16 = vsel %vm698_vm2, %v970_v12, -inf }
 0x395   : > { %972 = vmax.xlane.f32.xlu0 %v971_v16  ;;  %v1661_v17 = vpop.f32.mrb[7].mxu0 }
 0x39a   : > { %v1075_v18 = vpop.f32.mrb[8].mxu0 }
 0x39b   : > { %v1081_v19 = vsel %vm695_vm3, -1e+30, %v1075_v18  ;;  %v1672_v20 = vpop.f32.mrb[9].mxu0 }
 0x39c   : > { %v1078_v21 = vpop.f32.mrb[10].mxu0  ;;  %v1082_v22 = vsel %vm698_vm2, %v1081_v19, -inf }
 0x39d   : > { %1083 = vmax.xlane.f32.xlu0 %v1082_v22  ;;  %v1673_v23 = vpop.f32.mrb[11].mxu0 }
 0x3a7   : > { %v748_v24 = vpop.xlane.xlu0 %747 }
 0x3a8   : > { %v749_v25 = vsub.f32 %v745_v63, %v748_v24 }
 0x3aa   : > { %v750_v26 = vmul.f32 1.442695, %v749_v25 }
 0x3ac   : > { %1803 = vpow2.f32 %v750_v26 }
 0x3b6   : > { %v1804_v27 = vpop.eup %1803 }
 0x3b7   : > { %v752_v28 = vsel %vm698_vm2, %v1804_v27, 0.0 }
 0x3b8   : > { %753 = vadd.xlane.f32.xlu0 %v752_v28 }
 0x41a   : > { %v862_v29 = vpop.xlane.xlu1 %861 }
 0x41b   : > { %v863_v30 = vsub.f32 %v859_v6, %v862_v29 }
 0x41d   : > { %v864_v31 = vmul.f32 1.442695, %v863_v30 }
 0x41f   : > { %1805 = vpow2.f32 %v864_v31  ;;  %v1555_v31 = vld [vmem:[%s2303_s8] ss:$0 sm:$0xff] }
 0x422   : > { %v973_v32 = vpop.xlane.xlu0 %972 }
 0x423   : > { %v974_v33 = vsub.f32 %v970_v12, %v973_v32 }
 0x425   : > { %v975_v34 = vmul.f32 1.442695, %v974_v33 }
 0x427   : > { %1807 = vpow2.f32 %v975_v34 }
 0x429   : > { %v1806_v35 = vpop.eup %1805 }
 0x42a   : > { %v866_v36 = vsel %vm698_vm2, %v1806_v35, 0.0  ;;  %v1084_v39 = vpop.xlane.xlu0 %1083 }
 0x42b   : > { %867 = vadd.xlane.f32.xlu1 %v866_v36  ;;  %v1085_v40 = vsub.f32 %v1081_v19, %v1084_v39 }
 0x42d   : > { %v1086_v41 = vmul.f32 1.442695, %v1085_v40 }
 0x42f   : > { %1809 = vpow2.f32 %v1086_v41 }
 0x431   : > { %v1808_v37 = vpop.eup %1807 }
 0x432   : > { %v977_v38 = vsel %vm698_vm2, %v1808_v37, 0.0 }
 0x433   : > { %978 = vadd.xlane.f32.xlu0 %v977_v38 }
 0x439   : > { %v1810_v42 = vpop.eup %1809 }
 0x43a   : > { %v1088_v43 = vsel %vm698_vm2, %v1810_v42, 0.0 }
 0x43c   : > { %872 = vrot.lane.b32.xlu1 %v2106_v47, %s1910_s24 }
 0x440   : > { %983 = vrot.lane.b32.xlu1 %v2106_v47, %s1911_s25  ;;  %s1914_s25 = smov 8  }
 0x445   : > { %v754_v44 = vpop.xlane.xlu0 %753 }
 0x446   : > { %1811 = vrcp.f32 %v754_v44  ;;  %v1789_v44 = vld [vmem:[%s2306_s11] sm:$0xff]  }
 0x449   : > { %759 = vrot.lane.b32.xlu0 %v2106_v47, %s1912_s18  ;;  %s1915_s18 = smov 16  }
 0x450   : > { %v1812_v46 = vpop.eup %1811 }
 0x451   : > { %v756_v49 = vmul.f32 %v1812_v46, %v1804_v27 }
 0x453   : > { %v757_v53 = vpack.c.bf16 %v756_v49, %v756_v49 }
 0x464   : > { %1089 = vadd.xlane.f32.xlu1 %v1088_v43 }
 0x475   : > { %1094 = vrot.lane.b32.xlu1 %v2106_v47, %s1913_s26  ;;  %s1916_s26 = smov 24  }
 0x4b8   : > { %v868_v45 = vpop.xlane.xlu1 %867 }
 0x4b9   : > { %1813 = vrcp.f32 %v868_v45 }
 0x4bc   : > { %v873_v52 = vpop.permute.xlu1 %872 }
 0x4bd   : > { %v878_v47 = vsel %vm764_vm4, %v873_v52, 0  ;;  %v1560_v52 = vld [vmem:[%s2305_s10] ss:$0 sm:$0xff] }
 0x4c0   : > { %v979_v48 = vpop.xlane.xlu0 %978  ;;  %v984_v56 = vpop.permute.xlu1 %983 }
 0x4c1   : > { %1815 = vrcp.f32 %v979_v48  ;;  %v989_v59 = vsel %vm764_vm4, %v984_v56, 0  ;;  %v1792_v56 = vld [vmem:[%s2308_s13 + $0x8] sm:$0xff]  }
 0x4c3   : > { %v1814_v54 = vpop.eup %1813 }
 0x4c4   : > { %v760_v50 = vpop.permute.xlu0 %759  ;;  %v870_v55 = vmul.f32 %v1814_v54, %v1806_v35 }
 0x4c5   : > { %v766_v51 = vsel %vm764_vm4, %v760_v50, 0  ;;  %v1559_v50 = vld [vmem:[%s2304_s9] ss:$0 sm:$0xff] }
 0x4c6   : > { %1639 = vmatpush3.bf16.msra.mxu1 %v766_v51  ;;  %v871_v57 = vpack.c.bf16 %v870_v55, %v870_v55  ;;  %v1791_v55 = vld [vmem:[%s2308_s13] sm:$0xff]  }
 0x4c7   : > { %1650 = vmatprep.subr.bf16.mxu1 %v1905_v13 }
 0x4c9   : > { %1641 = vmatmul.mubr.msk.bf16.vlgmr.msra.gmra.mrb[12].mxu1 %vm698_vm2, %v757_v53 }
 0x4ca   : > { %1651 = vmatpush3.bf16.msra.mxu1 %v878_v47  ;;  %1652 = vmatprep.mubr.msk.bf16.mxu1 %vm1906_vm1, %v1905_v13 }
 0x4cb   : > { %1662 = vmatprep.subr.bf16.mxu1 %v1905_v13  ;;  %v1816_v58 = vpop.eup %1815 }
 0x4cc   : > { %v981_v60 = vmul.f32 %v1816_v58, %v1808_v37  ;;  %v1794_v58 = vld [vmem:[%s2308_s13 + $0x18] sm:$0xff]  }
 0x4ce   : > { %v982_v61 = vpack.c.bf16 %v981_v60, %v981_v60  ;;  %v1796_v60 = vld [vmem:[%s2308_s13 + $0x28] sm:$0xff]  }
 0x4d1   : > { %1653 = vmatmul.mubr.msk.bf16.vlgmr.msra.gmra.mrb[16].mxu1 %vm698_vm2, %v871_v57  ;;  %v1793_v57 = vld [vmem:[%s2308_s13 + $0x10] sm:$0xff]  }
 0x4d2   : > { %1663 = vmatpush3.bf16.msra.mxu1 %v989_v59  ;;  %1664 = vmatprep.mubr.msk.bf16.mxu1 %vm1906_vm1, %v1905_v13  ;;  %v1795_v59 = vld [vmem:[%s2308_s13 + $0x20] sm:$0xff]  }
 0x4d3   : > { %1674 = vmatprep.subr.bf16.mxu1 %v1905_v13 }
 0x4d9   : > { %1665 = vmatmul.mubr.msk.bf16.vlgmr.msra.gmra.mrb[20].mxu1 %vm698_vm2, %v982_v61  ;;  %v1797_v61 = vld [vmem:[%s2308_s13 + $0x30] sm:$0xff]  }
 0x4da   : > { %1676 = vmatprep.mubr.msk.bf16.mxu1 %vm1906_vm1, %v1905_v13 }
 0x4f1   : > { %v1090_v62 = vpop.xlane.xlu1 %1089 }
 0x4f2   : > { %1817 = vrcp.f32 %v1090_v62  ;;  %v1798_v62 = vld [vmem:[%s2308_s13 + $0x38] sm:$0xff]  }
 0x4f5   : > { %v1095_v63 = vpop.permute.xlu1 %1094 }
 0x4f6   : > { %v1100_v1 = vsel %vm764_vm4, %v1095_v63, 0  ;;  %v1561_v63 = vld [vmem:[%s2307_s12] ss:$0 sm:$0xff] }
 0x4f7   : > { %1675 = vmatpush3.bf16.msra.mxu1 %v1100_v1 }
 0x4f8   : > { %1688 = vmatprep.subr.bf16.mxu1 %v1905_v13 }
 0x4fc   : > { %v1818_v2 = vpop.eup %1817 }
 0x4fd   : > { %v1092_v3 = vmul.f32 %v1818_v2, %v1810_v42 }
 0x4ff   : > { %v1093_v4 = vpack.c.bf16 %v1092_v3, %v1092_v3 }
 0x501   : > { %1677 = vmatmul.mubr.msk.bf16.vlgmr.msra.gmra.mrb[24].mxu1 %vm698_vm2, %v1093_v4 }
 0x502   : > { %1692 = vmatprep.mubr.msk.bf16.mxu1 %vm1906_vm1, %v1905_v13  ;;  %1689 = vmatpush3.bf16.msra.mxu1 %v1789_v44 }
 0x503   : > { %1690 = vmatprep.subr.bf16.mxu1 %v1905_v13 }
 0x59c   : > { %v802_v5 = vpop.f32.mrb[12].mxu1 }
 0x59d   : > { %v1642_v6 = vpop.f32.mrb[13].mxu1 }
 0x59e   : > { %v805_v7 = vpop.f32.mrb[14].mxu1 }
 0x59f   : > { %v1643_v8 = vpop.f32.mrb[15].mxu1 }
 0x5a4   : > { %v914_v11 = vpop.f32.mrb[16].mxu1 }
 0x5a5   : > { %1143 = vrot.lane.b32.xlu0 %v914_v11, %s1914_s25  ;;  %v1654_v12 = vpop.f32.mrb[17].mxu1 }
 0x5a6   : > { %v917_v14 = vpop.f32.mrb[18].mxu1  ;;  %v1566_v12 = vld [vmem:[%s2309_s14] ss:$0 sm:$0xff] }
 0x5a7   : > { %v1655_v15 = vpop.f32.mrb[19].mxu1 }
 0x5ac   : > { %v1025_v16 = vpop.f32.mrb[20].mxu1 }
 0x5ad   : > { %1147 = vrot.lane.b32.xlu1 %v1025_v16, %s1915_s18  ;;  %v1666_v17 = vpop.f32.mrb[21].mxu1 }
 0x5ae   : > { %v1028_v18 = vpop.f32.mrb[22].mxu1 }
 0x5af   : > { %v1667_v19 = vpop.f32.mrb[23].mxu1 }
 0x5d4   : > { %v1136_v20 = vpop.f32.mrb[24].mxu1 }
 0x5d5   : > { %1151 = vrot.lane.b32.xlu0 %v1136_v20, %s1916_s26  ;;  %v1678_v21 = vpop.f32.mrb[25].mxu1  ;;  %s497_s26 = sand.u32 1, %s1887_s19  }
 0x5d6   : > { %v1139_v22 = vpop.f32.mrb[26].mxu1  ;;  %s1535_s0 = sshll.u32 %s497_s26, 3  ;;  %s1446_s21 = scalar_lea.sflag [#allocation3], %s497_s26 }
 0x5d7   : > { %v1679_v23 = vpop.f32.mrb[27].mxu1  ;;  %s499_s24 = scalar_lea.vmem [#allocation2], %s1535_s0 }
 0x5d8   : > { %s1460_s25 = sshll.u32 %s499_s24, 4  ;;  %s2249_s25 = int_to_ptr.vmem [resolvable:$true] %s1460_s25 }
 0x5d9   : > { %s1825_s0 = scalar_lea.vmem %s2249_s25, 128  ;;  %p1832_p1 = scmp.lt.s32.totalorder %s2249_s25, %s1830_s29 }
 0x5da   : > { %p1826_p12 = scmp.ne.s32.totalorder %s2249_s25, %s1825_s0  ;;  %p1833_p2 = scmp.lt.s32.totalorder %s1831_s3, %s1825_s0 }
 0x5dc   : > { %p1827_p13 = pnand %p1826_p12, %p2038_p4  ;;  %p1834_p3 = por %p1833_p2, %p1832_p1 }
 0x5de   : > { %p1828_p0 = pneg %p1827_p13 }
 0x5e0   : > { %p1835_p5 = pnand %p1834_p3, %p1828_p0 }
 0x617   : > { %v1144_v24 = vpop.permute.xlu0 %1143 }
 0x618   : > { %v1154_v26 = vsel %vm698_vm2, %v802_v5, %v1144_v24 }
 0x61f   : > { %v1148_v25 = vpop.permute.xlu1 %1147 }
 0x620   : > { %v1156_v27 = vsel %vm1155_vm5, %v1154_v26, %v1148_v25 }
 0x647   : > { %v1152_v28 = vpop.permute.xlu0 %1151 }
 0x648   : > { %v1158_v29 = vsel %vm1157_vm6, %v1156_v27, %v1152_v28 }
 0x649   : > { %v1163_v30 = vpack.c.bf16 %v1158_v29, %v1158_v29 }
 0x64b   : > { %1685 = vmatmul.mubr.msk.bf16.vlgmr.msra.gmra.mrb[12].mxu0 %vm511_vm0, %v1163_v30 }
 0x64c   : > { %1712 = vmatprep.mubr.msk.bf16.mxu0 %vm1906_vm1, %v1905_v13  ;;  %1697 = vmatpush3.bf16.msra.mxu0 %v1791_v55 }
 0x64d   : > { %1698 = vmatprep.subr.bf16.mxu0 %v1905_v13 }
 0x650   : > { %1699 = vmatpush3.bf16.msra.mxu0 %v1792_v56 }
 0x651   : > { %1700 = vmatprep.subr.bf16.mxu0 %v1905_v13 }
 0x654   : > { %1701 = vmatpush3.bf16.msra.mxu0 %v1793_v57 }
 0x655   : > { %1702 = vmatprep.subr.bf16.mxu0 %v1905_v13 }
 0x658   : > { %1703 = vmatpush3.bf16.msra.mxu0 %v1794_v58 }
 0x659   : > { %1704 = vmatprep.subr.bf16.mxu0 %v1905_v13 }
 0x65c   : > { %1705 = vmatpush3.bf16.msra.mxu0 %v1795_v59 }
 0x65d   : > { %1706 = vmatprep.subr.bf16.mxu0 %v1905_v13 }
 0x660   : > { %1707 = vmatpush3.bf16.msra.mxu0 %v1796_v60 }
 0x661   : > { %1708 = vmatprep.subr.bf16.mxu0 %v1905_v13 }
 0x664   : > { %1709 = vmatpush3.bf16.msra.mxu0 %v1797_v61 }
 0x665   : > { %1710 = vmatprep.subr.bf16.mxu0 %v1905_v13 }
 0x668   : > { %1711 = vmatpush3.bf16.msra.mxu0 %v1798_v62 }
 0x71e   : > { %v1220_v32 = vpop.f32.mrb[12].mxu0 }
 0x71f   : > { %v1221_v33 = vadd.f32 %v1555_v31, %v1220_v32  ;;  %v1686_v34 = vpop.f32.mrb[13].mxu0 }
 0x720   : > { %v1223_v35 = vpop.f32.mrb[14].mxu0 }
 0x721   : > { %v2184_v36 = vadd.f32 %v1221_v33, %v2058_v0  ;;  %v1687_v37 = vpop.f32.mrb[15].mxu0  ;;  %v1790_v0 = vld [vmem:[%s2306_s11 + $0x8] sm:$0xff]  }
 0x722   : > { %1691 = vmatpush3.bf16.msra.mxu1 %v1790_v0 }
 0x723   : > { %v1229_v38 = vsel %vm511_vm0, %v2184_v36, 0.0 }
 0x724   : > { %1230 = vadd.xlane.f32.xlu1 %v1229_v38 }
 0x7b1   : > { %v1231_v39 = vpop.xlane.xlu1 %1230 }
 0x7b2   : > { %v1232_v40 = vmul.f32 0.03125, %v1231_v39 }
 0x7b4   : > { %v1233_v41 = vsub.f32 %v2184_v36, %v1232_v40 }
 0x7b6   : > { %v1234_v42 = vmul.f32 %v1233_v41, %v1233_v41 }
 0x7b8   : > { %v1235_v43 = vsel %vm511_vm0, %v1234_v42, 0.0 }
 0x7b9   : > { %1236 = vadd.xlane.f32.xlu0 %v1235_v43 }
 0x846   : > { %v1237_v45 = vpop.xlane.xlu0 %1236 }
 0x847   : > { %v1238_v46 = vmul.f32 0.03125, %v1237_v45 }
 0x849   : > { %v1239_v48 = vadd.f32 1e-05, %v1238_v46 }
 0x84b   : > { %1819 = vrsqrt.f32 %v1239_v48 }
 0x855   : > { %v1820_v49 = vpop.eup %1819 }
 0x856   : > { %v1241_v51 = vmul.f32 %v1820_v49, %v1233_v41 }
 0x858   : > { %v1248_v53 = vmul.f32 %v1559_v50, %v1241_v51 }
 0x85a   : > { %v1255_v54 = vadd.f32 %v1560_v52, %v1248_v53 }
 0x85c   : > { %v1260_v47 = vpack.c.bf16 %v1255_v54, %v1255_v54 }
 0x85e   : > { %1693 = vmatmul.mubr.msk.bf16.vlgmr.msra.gmra.mrb[28].mxu1 %vm511_vm0, %v1260_v47 }
 0x931   : > { %v1317_v1 = vpop.f32.mrb[28].mxu1 }
 0x932   : > { %v1318_v2 = vadd.f32 %v1561_v63, %v1317_v1  ;;  %v1694_v3 = vpop.f32.mrb[29].mxu1 }
 0x933   : > { %v1320_v4 = vpop.f32.mrb[30].mxu1 }
 0x934   : > { %v1565_v5 = vmul.f32 -1.702, %v1318_v2  ;;  %v1695_v6 = vpop.f32.mrb[31].mxu1 }
 0x936   : > { %v1325_v7 = vmul.f32 1.442695, %v1565_v5 }
 0x938   : > { %1821 = vpow2.f32 %v1325_v7 }
 0x942   : > { %v1822_v13 = vpop.eup %1821 }
 0x943   : > { %v1327_v8 = vadd.f32 1.0, %v1822_v13 }
 0x945   : > { %1823 = vrcp.f32 %v1327_v8 }
 0x94f   : > { %v1824_v9 = vpop.eup %1823 }
 0x950   : > { %v1330_v10 = vmul.f32 %v1824_v9, %v1318_v2 }
 0x952   : > { %v1347_v11 = vpack.c.bf16 %v1330_v10, %v1330_v10 }
 0x954   : > { %1713 = vmatmul.mubr.bf16.vlgmr.msra.gmra.mrb[16].mxu0 %v1347_v11 }
 0xa27   : > { %v1437_v14 = vpop.f32.mrb[16].mxu0 }
 0xa28   : > { %v1438_v15 = vadd.f32 %v1566_v12, %v1437_v14  ;;  %v1714_v16 = vpop.f32.mrb[17].mxu0 }
 0xa29   : > { %v1440_v17 = vpop.f32.mrb[18].mxu0 }
 0xa2a   : > { %v1443_v18 = vadd.f32 %v1438_v15, %v2184_v36  ;;  %v1715_v19 = vpop.f32.mrb[19].mxu0 }
 0xa2c   : > { %1444 = vst.msk [vmem:[%s499_s24] sm:$0xff] %vm511_vm0, %v1443_v18 }
 0xa2d   : > { %1838 = shalt.err (!%p1835_p5)
}
 0xa2e   : > { %s1839_s1 = scalar_lea.hbm %s2247_s2, 128  ;;  %s1843_s24 = scalar_lea.hbm %s2310_s15, 256 }
 0xa2f   : > { %p1840_p6 = scmp.ne.s32.totalorder %s2247_s2, %s1839_s1  ;;  %p1844_p10 = scmp.lt.u32.totalorder %s2247_s2, %s2310_s15 }
 0xa30   : > { %p1845_p11 = scmp.lt.u32.totalorder %s1843_s24, %s1839_s1  ;;  %p1847_p13 = scmp.lt.u32.totalorder %s1839_s1, %s2247_s2 }
 0xa31   : > { %p1841_p7 = pnand %p1840_p6, %p2038_p4 }
 0xa32   : > { %p1846_p12 = por %p1845_p11, %p1844_p10 }
 0xa33   : > { %p1842_p9 = pneg %p1841_p7 }
 0xa34   : > { %p1848_p0 = por %p1847_p13, %p1846_p12 }
 0xa36   : > { %p1849_p1 = pnand %p1848_p0, %p1842_p9 }
 0xa38   : > { %1852 = shalt.err (!%p1849_p1)
}
 0xa39   : > { %1716 = dma.vmem_to_hbm [thread:$0]  (%p2038_p4), %s2249_s25, 128, %s2247_s2, %s1446_s21  }
 0xa3a PF: > { %s2325_s3 = sld [smem:[#allocation5_spill]]  ;;  %p1722_p2 = scmp.ge.s32.totalorder %s1903_s23, 2 }
 0xa3c   : > { %p1719_p3 = pnand %p1722_p2, %p2045_p8 }
 0xa40   : > { %s1472_s0 = sand.u32 1, %s2325_s3  }
 0xa41   : > { %s1473_s29 = scalar_lea.sflag [#allocation3], %s1472_s0 }
 0xa42   : > { %1878 = dma.done.wait (!%p1719_p3), %s1473_s29, 128  }
 0xa43   : > { %1880 = vsyncadd (!%p1719_p3), %s1473_s29, 4294967168  ;;  %s28_s23 = sadd.s32 1, %s1903_s23   ;;  %s2326_s28 = sld [smem:[#allocation6_spill]] }
 0xa44   : > { %p25_p5 = scmp.ge.s32.totalorder %s28_s23, 4   ;;  %s2327_s18 = smov %s1887_s19 }
 0xa45   : > { %s2328_s19 = smov %s1891_s20  ;;  %s2329_s20 = smov %s2051_s16 }
 0xa46   : > { %s2330_s21 = smov %s1899_s22  ;;  %27 = sbr.rel (!%p25_p5) target bundleno = 9 (0x9), region = 116 }
 0xa49   : > { %s2331_s22 = smov %s2326_s28 }
 0xa4d   :  { %1478 = vsyncpa [#allocation3], 1 }
 0xa4e   :  { %1480 = vsyncpa [#allocation3 + $0x1], 1 }

</bundles_post_ra>
